<compile_context>
chip_gen: v7x
topology: tpu7x:2x2x1
jax: 0.10.0
libtpu: 0.0.40
codegen_flags: <defaults>
</compile_context>

<pallas_src>
import functools

import jax
import jax.numpy as jnp
from jax.experimental import pallas as pl
from jax.experimental.pallas import tpu as pltpu


_NEG_BIG = -1e30  # pad-label bias -> exp underflows to exactly 0 in softmax


def _round_up(x: int, m: int) -> int:
    return ((x + m - 1) // m) * m


def _cdiv(a: int, b: int) -> int:
    return (a + b - 1) // b


def classifier_kernel(x_ref, w1_ref, b1_ref, w2_ref, b2_ref, out_ref, acc_ref):
    """One (batch-tile, K-tile) grid step.

    Accumulates the first Linear over the K grid axis into an f32 VMEM
    scratch; on the last K step applies the folded BN bias, ReLU, the
    lane-padded head Linear and an exact softmax, then stores the tile.
    """
    k = pl.program_id(1)

    @pl.when(k == 0)
    def _():
        acc_ref[...] = jnp.zeros_like(acc_ref)

    # ---- Layer 0 partial matmul (bf16 inputs, f32 MXU accumulation) ----
    acc_ref[...] += jnp.dot(x_ref[...], w1_ref[...],
                            preferred_element_type=jnp.float32)

    @pl.when(k == pl.num_programs(1) - 1)
    def _():
        # Folded eval-mode BatchNorm + bias, then ReLU (Dropout = identity).
        h = jnp.maximum(acc_ref[...] + b1_ref[...], 0.0)

        # Head Linear(n_hidden -> 128 padded label lanes); pad bias = -1e30.
        z = jnp.dot(h, w2_ref[...], preferred_element_type=jnp.float32)
        z = z + b2_ref[...]

        # Exact softmax over the last dim (pad lanes contribute exp(...)=0).
        m = jnp.max(z, axis=-1, keepdims=True)
        e = jnp.exp(z - m)
        denom = jnp.sum(e, axis=-1, keepdims=True)
        out_ref[...] = (e / denom).astype(out_ref.dtype)


@functools.partial(
    jax.jit,
    static_argnames=("n_labels", "max_tile_n", "max_tile_k",
                     "compute_dtype", "out_dtype", "vmem_budget_bytes"))
def classifier_forward(x, w1, b1, w2, b2, *, n_labels,
                       max_tile_n=2048, max_tile_k=1024,
                       compute_dtype=jnp.bfloat16, out_dtype=jnp.bfloat16,
                       vmem_budget_bytes=40 * 1024 * 1024):
    """Run the whole Classifier forward as one tiled Pallas call.

    w1: (D, H) with eval-mode BN folded in; b1: (1, H) folded bias.
    w2: (H, L_pad) zero-padded columns; b2: (1, L_pad) with -1e30 on pad cols.
    """
    n, d = x.shape
    hdim = w1.shape[1]
    l_pad = w2.shape[1]

    in_bytes = jnp.dtype(compute_dtype).itemsize
    out_bytes = jnp.dtype(out_dtype).itemsize

    # ---- K (input-feature) tiling: stream w1 in (tile_k, H) blocks ----
    if d <= max_tile_k:
        tile_k, d_pad = d, d            # single K block (full-dim block is legal)
    else:
        tile_k = max_tile_k             # multiple of 128
        d_pad = _round_up(d, tile_k)
    k_tiles = d_pad // tile_k

    # ---- batch tile from the VMEM budget (count every block double-buffered) ----
    fixed = 2 * (tile_k * hdim * in_bytes)                      # w1 block
    fixed += 2 * (hdim * 4 + hdim * l_pad * 4 + l_pad * 4)      # b1, w2, b2
    per_row = 2 * tile_k * in_bytes + 2 * l_pad * out_bytes + hdim * 4  # x, out, acc
    tile_n = max((vmem_budget_bytes - fixed) // per_row, 8)
    tile_n = max((int(min(tile_n, max_tile_n)) // 8) * 8, 8)

    # Minimize batch padding; give the 2nd TensorCore (v7x) work when possible.
    n_tiles = _cdiv(n, tile_n)
    if n_tiles == 1 and n > 8:
        n_tiles = 2  # TODO(synk): try pltpu.CORE_PARALLEL on the batch axis on v7x
    tile_n = _round_up(_cdiv(n, n_tiles), 8)
    n_pad = n_tiles * tile_n

    # bf16 cast + exact zero padding of batch rows / input features.
    x = x.astype(compute_dtype)
    if (n_pad, d_pad) != (n, d):
        x = jnp.pad(x, ((0, n_pad - n), (0, d_pad - d)))
    w1 = w1.astype(compute_dtype)
    if d_pad != d:
        w1 = jnp.pad(w1, ((0, d_pad - d), (0, 0)))

    needed = fixed + tile_n * per_row
    vmem_limit = int(min(max(needed + (4 << 20), 32 << 20), 60 << 20))

    out = pl.pallas_call(
        classifier_kernel,
        out_shape=jax.ShapeDtypeStruct((n_pad, l_pad), out_dtype),
        grid=(n_tiles, k_tiles),
        in_specs=[
            pl.BlockSpec((tile_n, tile_k), lambda i, k: (i, k)),  # x: streamed
            pl.BlockSpec((tile_k, hdim), lambda i, k: (k, 0)),    # w1: streamed over K
            pl.BlockSpec((1, hdim), lambda i, k: (0, 0)),         # b1 (BN-folded)
            pl.BlockSpec((hdim, l_pad), lambda i, k: (0, 0)),     # w2 (lane-padded)
            pl.BlockSpec((1, l_pad), lambda i, k: (0, 0)),        # b2 (lane-padded)
        ],
        out_specs=pl.BlockSpec((tile_n, l_pad), lambda i, k: (i, 0)),
        scratch_shapes=[pltpu.VMEM((tile_n, hdim), jnp.float32)],
        compiler_params=pltpu.CompilerParams(
            dimension_semantics=("parallel", "arbitrary"),
            vmem_limit_bytes=vmem_limit),
    )(x, w1, b1, w2, b2)

    # TODO(synk): skip this slice when downstream can consume the padded slab
    # (it costs roughly one extra pass of output HBM traffic).
    return out[:n, :n_labels]


def init_params(key, n_input, n_hidden=128, n_labels=5):
    """PyTorch-shaped synthetic params, pre-folded/padded for the kernel."""
    k1, k2, k3, k4 = jax.random.split(key, 4)

    # nn.Linear(n_input, n_hidden): weight (n_hidden, n_input), bias (n_hidden,)
    bound1 = 1.0 / jnp.sqrt(n_input)
    w1_t = jax.random.uniform(k1, (n_hidden, n_input), jnp.float32, -bound1, bound1)
    b1 = jax.random.uniform(k2, (n_hidden,), jnp.float32, -bound1, bound1)

    # BatchNorm1d(n_hidden, eps=0.001) in eval mode with fresh running stats.
    eps = 0.001
    gamma = jnp.ones((n_hidden,), jnp.float32)
    beta = jnp.zeros((n_hidden,), jnp.float32)
    running_mean = jnp.zeros((n_hidden,), jnp.float32)
    running_var = jnp.ones((n_hidden,), jnp.float32)
    bn_scale = gamma / jnp.sqrt(running_var + eps)
    bn_shift = beta - running_mean * bn_scale

    # nn.Linear(n_hidden, n_labels)
    bound2 = 1.0 / jnp.sqrt(n_hidden)
    w2_t = jax.random.uniform(k3, (n_labels, n_hidden), jnp.float32, -bound2, bound2)
    b2 = jax.random.uniform(k4, (n_labels,), jnp.float32, -bound2, bound2)

    # ---- Fold eval-mode BN + bias into the first Linear (exact) ----
    w1_in_out = w1_t.T                                  # (n_input, n_hidden)
    w1_folded = w1_in_out * bn_scale[None, :]
    b1_folded = (b1 * bn_scale + bn_shift).reshape(1, n_hidden)

    # ---- Pad head to 128 lanes: zero weights, -1e30 bias on pad columns ----
    l_pad = max(128, _round_up(n_labels, 128))
    w2_pad = jnp.zeros((n_hidden, l_pad), jnp.float32)
    w2_pad = w2_pad.at[:, :n_labels].set(w2_t.T)
    b2_pad = jnp.full((1, l_pad), _NEG_BIG, jnp.float32)
    b2_pad = b2_pad.at[0, :n_labels].set(b2)

    kernel_params = {"w1": w1_folded, "b1": b1_folded, "w2": w2_pad, "b2": b2_pad}
    raw_params = {"w1": w1_in_out, "b1": b1, "bn_scale": bn_scale,
                  "bn_shift": bn_shift, "w2": w2_t.T, "b2": b2}
    return kernel_params, raw_params


def reference_forward(x, raw):
    """Pure-JAX reference of the PyTorch eval-mode forward (f32)."""
    h = x @ raw["w1"] + raw["b1"]
    h = h * raw["bn_scale"] + raw["bn_shift"]
    h = jnp.maximum(h, 0.0)
    z = h @ raw["w2"] + raw["b2"]
    return jax.nn.softmax(z, axis=-1)


def reference_forward_folded(x, w1_folded, b1_folded, w2, b2):
    """Reference using the already-folded layer-0 params (for bf16-matched check)."""
    h = jnp.maximum(x @ w1_folded + b1_folded, 0.0)
    z = h @ w2 + b2
    return jax.nn.softmax(z, axis=-1)


if __name__ == "__main__":
    key = jax.random.PRNGKey(0)
    kx, kp = jax.random.split(key)

    batch = 8
    n_input = 32
    n_hidden = 128
    n_labels = 5

    x = jax.random.normal(kx, (batch, n_input), jnp.float32)
    kernel_params, raw_params = init_params(kp, n_input, n_hidden, n_labels)

    probs = classifier_forward(
        x,
        kernel_params["w1"], kernel_params["b1"],
        kernel_params["w2"], kernel_params["b2"],
        n_labels=n_labels,
    )
    probs = jax.block_until_ready(probs).astype(jnp.float32)

    # Sanity: shape and softmax rows sum to 1 (bf16 output rounding allowed).
    assert probs.shape == (batch, n_labels)
    assert jnp.allclose(jnp.sum(probs, axis=-1), 1.0, atol=2e-2)

    # Tight check vs a reference that sees the same bf16-quantized inputs.
    x_q = x.astype(jnp.bfloat16).astype(jnp.float32)
    w1_q = kernel_params["w1"].astype(jnp.bfloat16).astype(jnp.float32)
    ref_q = reference_forward_folded(x_q, w1_q, kernel_params["b1"],
                                     raw_params["w2"], raw_params["b2"])
    assert jnp.allclose(probs, ref_q, atol=1.5e-2, rtol=1.5e-2)

    # Loose check vs the exact f32 PyTorch-eval-mode reference.
    ref = reference_forward(x, raw_params)
    assert jnp.allclose(probs, ref, atol=5e-2, rtol=5e-2)

    print("KERNEL_OK")
</pallas_src>

<mosaic_0001>
module attributes {stable_mosaic.version = 11 : i64} {
  func.func @classifier_kernel(%arg0: i32, %arg1: i32, %arg2: memref<8x32xbf16, #tpu.memory_space<vmem>>, %arg3: memref<32x128xbf16, #tpu.memory_space<vmem>>, %arg4: memref<1x128xf32, #tpu.memory_space<vmem>>, %arg5: memref<128x128xf32, #tpu.memory_space<vmem>>, %arg6: memref<1x128xf32, #tpu.memory_space<vmem>>, %arg7: memref<8x128xbf16, #tpu.memory_space<vmem>>, %arg8: memref<8x128xf32, #tpu.memory_space<vmem>>) attributes {dimension_semantics = [#tpu.dimension_semantics<parallel>, #tpu.dimension_semantics<arbitrary>], iteration_bounds = array<i64: 1, 1>, scalar_prefetch = 0 : i64, scratch_operands = 1 : i64, tpu.core_type = #tpu.core_type<tc>, window_params = [{transform_indices = @transform_0, window_bounds = array<i64: 8, 32>}, {transform_indices = @transform_1, window_bounds = array<i64: 32, 128>}, {pipeline_mode = #tpu.pipeline_mode<synchronous>, transform_indices = @transform_2, window_bounds = array<i64: 1, 128>}, {pipeline_mode = #tpu.pipeline_mode<synchronous>, transform_indices = @transform_3, window_bounds = array<i64: 128, 128>}, {pipeline_mode = #tpu.pipeline_mode<synchronous>, transform_indices = @transform_4, window_bounds = array<i64: 1, 128>}, {transform_indices = @transform_5, window_bounds = array<i64: 8, 128>}]} {
    %c0_i32 = arith.constant 0 : i32
    %0 = arith.cmpi eq, %arg1, %c0_i32 : i32
    %1 = arith.extui %0 : i1 to i32
    %c0_i32_0 = arith.constant 0 : i32
    %2 = arith.cmpi ne, %1, %c0_i32_0 : i32
    scf.if %2 {
      %cst_10 = arith.constant 0.000000e+00 : f32
      %12 = vector.broadcast %cst_10 : f32 to vector<8x128xf32>
      %c0_11 = arith.constant 0 : index
      %c0_12 = arith.constant 0 : index
      %13 = vector.load %arg8[%c0_11, %c0_12] : memref<8x128xf32, #tpu.memory_space<vmem>>, vector<8x128xf32>
      tpu.vector_store %arg8[%c0_11, %c0_12], %12 {strides = array<i32>} : memref<8x128xf32, #tpu.memory_space<vmem>>, vector<8x128xf32>,
    } else {
    }
    %c0 = arith.constant 0 : index
    %c0_1 = arith.constant 0 : index
    %3 = vector.load %arg8[%c0, %c0_1] : memref<8x128xf32, #tpu.memory_space<vmem>>, vector<8x128xf32>
    %c0_2 = arith.constant 0 : index
    %c0_3 = arith.constant 0 : index
    %4 = vector.load %arg2[%c0_2, %c0_3] : memref<8x32xbf16, #tpu.memory_space<vmem>>, vector<8x32xbf16>
    %c0_4 = arith.constant 0 : index
    %c0_5 = arith.constant 0 : index
    %5 = vector.load %arg3[%c0_4, %c0_5] : memref<32x128xbf16, #tpu.memory_space<vmem>>, vector<32x128xbf16>
    %cst = arith.constant dense<0.000000e+00> : vector<8x128xf32>
    %6 = tpu.matmul %4, %5, %cst {dimension_numbers = #tpu.dot_dimension_numbers<[1], [0], [0], [1], [0, 0, 1, 1], [], []>} : vector<8x32xbf16>, vector<32x128xbf16>, vector<8x128xf32> -> vector<8x128xf32>
    %7 = arith.addf %3, %6 : vector<8x128xf32>
    %c0_6 = arith.constant 0 : index
    %c0_7 = arith.constant 0 : index
    %8 = vector.load %arg8[%c0_6, %c0_7] : memref<8x128xf32, #tpu.memory_space<vmem>>, vector<8x128xf32>
    tpu.vector_store %arg8[%c0_6, %c0_7], %7 {strides = array<i32>} : memref<8x128xf32, #tpu.memory_space<vmem>>, vector<8x128xf32>,
    %c0_i32_8 = arith.constant 0 : i32
    %9 = arith.cmpi eq, %arg1, %c0_i32_8 : i32
    %10 = arith.extui %9 : i1 to i32
    %c0_i32_9 = arith.constant 0 : i32
    %11 = arith.cmpi ne, %10, %c0_i32_9 : i32
    scf.if %11 {
      %c0_10 = arith.constant 0 : index
      %c0_11 = arith.constant 0 : index
      %12 = vector.load %arg8[%c0_10, %c0_11] : memref<8x128xf32, #tpu.memory_space<vmem>>, vector<8x128xf32>
      %c0_12 = arith.constant 0 : index
      %c0_13 = arith.constant 0 : index
      %13 = vector.load %arg4[%c0_12, %c0_13] : memref<1x128xf32, #tpu.memory_space<vmem>>, vector<1x128xf32>
      %14 = vector.broadcast %13 : vector<1x128xf32> to vector<8x128xf32>
      %15 = arith.addf %12, %14 : vector<8x128xf32>
      %cst_14 = arith.constant 0.000000e+00 : f32
      %16 = vector.broadcast %cst_14 : f32 to vector<8x128xf32>
      %17 = arith.maximumf %15, %16 : vector<8x128xf32>
      %c0_15 = arith.constant 0 : index
      %c0_16 = arith.constant 0 : index
      %18 = vector.load %arg5[%c0_15, %c0_16] : memref<128x128xf32, #tpu.memory_space<vmem>>, vector<128x128xf32>
      %cst_17 = arith.constant dense<0.000000e+00> : vector<8x128xf32>
      %19 = tpu.matmul %17, %18, %cst_17 {dimension_numbers = #tpu.dot_dimension_numbers<[1], [0], [0], [1], [0, 0, 1, 1], [], []>} : vector<8x128xf32>, vector<128x128xf32>, vector<8x128xf32> -> vector<8x128xf32>
      %c0_18 = arith.constant 0 : index
      %c0_19 = arith.constant 0 : index
      %20 = vector.load %arg6[%c0_18, %c0_19] : memref<1x128xf32, #tpu.memory_space<vmem>>, vector<1x128xf32>
      %21 = vector.broadcast %20 : vector<1x128xf32> to vector<8x128xf32>
      %22 = arith.addf %19, %21 : vector<8x128xf32>
      %cst_20 = arith.constant dense<0xFF800000> : vector<8xf32>
      %23 = vector.multi_reduction <maximumf>, %22, %cst_20 [1] : vector<8x128xf32> to vector<8xf32>
      %24 = vector.shape_cast %23 : vector<8xf32> to vector<8x1xf32>
      %25 = vector.broadcast %24 : vector<8x1xf32> to vector<8x128xf32>
      %26 = arith.subf %22, %25 : vector<8x128xf32>
      %27 = math.exp %26 : vector<8x128xf32>
      %cst_21 = arith.constant dense<0.000000e+00> : vector<8xf32>
      %28 = vector.multi_reduction <add>, %27, %cst_21 [1] : vector<8x128xf32> to vector<8xf32>
      %29 = vector.shape_cast %28 : vector<8xf32> to vector<8x1xf32>
      %30 = vector.broadcast %29 : vector<8x1xf32> to vector<8x128xf32>
      %31 = arith.divf %27, %30 : vector<8x128xf32>
      %32 = arith.truncf %31 : vector<8x128xf32> to vector<8x128xbf16>
      %c0_22 = arith.constant 0 : index
      %c0_23 = arith.constant 0 : index
      %33 = vector.load %arg7[%c0_22, %c0_23] : memref<8x128xbf16, #tpu.memory_space<vmem>>, vector<8x128xbf16>
      tpu.vector_store %arg7[%c0_22, %c0_23], %32 {strides = array<i32>} : memref<8x128xbf16, #tpu.memory_space<vmem>>, vector<8x128xbf16>,
    } else {
    }
    return
  }
  func.func @transform_0(%arg0: i32, %arg1: i32) -> (i32, i32) {
    %c0_i32 = arith.constant 0 : i32
    return %arg0, %arg1 : i32, i32
  }
  func.func @transform_1(%arg0: i32, %arg1: i32) -> (i32, i32) {
    %c0_i32 = arith.constant 0 : i32
    %c0_i32_0 = arith.constant 0 : i32
    return %arg1, %c0_i32 : i32, i32
  }
  func.func @transform_2(%arg0: i32, %arg1: i32) -> (i32, i32) {
    %c0_i32 = arith.constant 0 : i32
    %c0_i32_0 = arith.constant 0 : i32
    %c0_i32_1 = arith.constant 0 : i32
    return %c0_i32, %c0_i32_0 : i32, i32
  }
  func.func @transform_3(%arg0: i32, %arg1: i32) -> (i32, i32) {
    %c0_i32 = arith.constant 0 : i32
    %c0_i32_0 = arith.constant 0 : i32
    %c0_i32_1 = arith.constant 0 : i32
    return %c0_i32, %c0_i32_0 : i32, i32
  }
  func.func @transform_4(%arg0: i32, %arg1: i32) -> (i32, i32) {
    %c0_i32 = arith.constant 0 : i32
    %c0_i32_0 = arith.constant 0 : i32
    %c0_i32_1 = arith.constant 0 : i32
    return %c0_i32, %c0_i32_0 : i32, i32
  }
  func.func @transform_5(%arg0: i32, %arg1: i32) -> (i32, i32) {
    %c0_i32 = arith.constant 0 : i32
    %c0_i32_0 = arith.constant 0 : i32
    return %arg0, %c0_i32 : i32, i32
  }
}

</mosaic_0001>

<bundles_post_ra>
// kernel: classifier_forward.1
= control target key start
LH: loop header
LB: loop body
LE: loop exit
PB: predicated region body
PF: predicated region fallthrough
CT: control target
= control target key end

     0   :  { %10 = vsyncpa [#allocation4], 0  ;;  %s466_s0 = inlined_call_operand.vmem [shape: bf16[8,32], index: 0, kind: input, shape index: {}]   ;;  %s467_s1 = inlined_call_operand.vmem [shape: bf16[32,128], index: 1, kind: input, shape index: {}]   ;;  %s468_s2 = inlined_call_operand.vmem [shape: f32[1,128], index: 2, kind: input, shape index: {}]   ;;  %s469_s3 = inlined_call_operand.hbm [shape: f32[128,128], index: 3, kind: input, shape index: {}]   ;;  %s470_s4 = inlined_call_operand.vmem [shape: f32[1,128], index: 4, kind: input, shape index: {}]   ;;  %s471_s5 = inlined_call_operand.hbm [shape: bf16[8,128], index: 5, kind: output, shape index: {}]  }
   0x1   :  { %11 = vsyncpa [#allocation5], 0  ;;  %s390_s18 = smov [#allocation3]   ;;  %s342_s22 = scalar_lea.hbm %s469_s3, 2048 }
   0x2   :  { %s23_s19 = sshll.u32 %s390_s18, 4  ;;  %p343_p0 = scmp.ne.s32.totalorder %s469_s3, %s342_s22  ;;  %s24_s19 = int_to_ptr.vmem [resolvable:$true] %s23_s19 }
   0x3   :  { %p346_p1 = scmp.lt.u32.totalorder %s342_s22, %s469_s3 }
   0x5   :  { %p348_p2 = pnand %p346_p1, %p343_p0 }
   0x7   :  { %351 = shalt.err (!%p348_p2)
}
   0x8   :  { %s352_s27 = scalar_lea.vmem %s24_s19, 2048  ;;  %p357_p4 = scmp.lt.s32.totalorder %s24_s19, %s24_s19 }
   0x9   :  { %p353_p3 = scmp.ne.s32.totalorder %s24_s19, %s352_s27  ;;  %p358_p5 = scmp.lt.s32.totalorder %s352_s27, %s352_s27 }
   0xb   :  { %p359_p6 = por %p358_p5, %p357_p4 }
   0xd   :  { %p360_p7 = pnand %p359_p6, %p353_p3 }
   0xf   :  { %363 = shalt.err (!%p360_p7)
}
  0x10   :  { %s391_s28 = smov 128   ;;  %s392_s29 = smov 8  }
  0x11   :  { %29 = dma.hbm_to_vmem [thread:$0]  %s469_s3, 2048, %s24_s19, [#allocation4], %s391_s28, %s391_s28, %s392_s29  }
  0x12   :  { %386 = dma.done.wait [#allocation4], 2048  }
  0x13   :  { %387 = vsyncadd [#allocation4], 4294965248  ;;  %v393_v0 = vmov 0.0   ;;  %vm394_vm0 = vmmov 0   ;;  %v395_v1 = vmov 0.0|0.0   ;;  %v336_v2 = vld [vmem:[%s467_s1] sm:$0xff]  }
  0x14   :  { %262 = vmatprep.subr.bf16.mxu0 %v393_v0  ;;  %266 = vmatprep.mubr.msk.bf16.mxu0 %vm394_vm0, %v393_v0  ;;  %v337_v3 = vld [vmem:[%s467_s1 + $0x8] sm:$0xff]   ;;  %v118_v4 = vld [vmem:[#allocation3] sm:$0xff]  ;;  %v119_v5 = vld [vmem:[#allocation3 + $0x8] sm:$0xff]  ;;  %vm59_vm1 = vcmask 261120  }
  0x15   :  { %305 = vmatprep.subr.bf16.mxu1 %v395_v1  ;;  %302 = vmatprep.mubr.msk.f32.mxu1 %vm394_vm0, %v393_v0  ;;  %v306_v6 = vpack.c.bf16 %v119_v5, %v118_v4  ;;  %v120_v7 = vld [vmem:[#allocation3 + $0x10] sm:$0xff]  ;;  %v121_v8 = vld [vmem:[#allocation3 + $0x18] sm:$0xff]  ;;  %v42_v10 = vld [vmem:[%s466_s0] sm:$0xf] }
  0x16   :  { %263 = vmatpush3.bf16.msra.mxu0 %v336_v2  ;;  %v309_v9 = vpack.c.bf16 %v121_v8, %v120_v7  ;;  %v122_v11 = vld [vmem:[#allocation3 + $0x20] sm:$0xff]  ;;  %v123_v12 = vld [vmem:[#allocation3 + $0x28] sm:$0xff]  ;;  %v124_v14 = vld [vmem:[#allocation3 + $0x30] sm:$0xff] }
  0x17   :  { %264 = vmatprep.subr.bf16.mxu0 %v393_v0  ;;  %307 = vmatpush3.bf16.msra.mxu1 %v306_v6  ;;  %v312_v13 = vpack.c.bf16 %v123_v12, %v122_v11  ;;  %v125_v15 = vld [vmem:[#allocation3 + $0x38] sm:$0xff]  ;;  %v126_v17 = vld [vmem:[#allocation3 + $0x40] sm:$0xff]  ;;  %v127_v18 = vld [vmem:[#allocation3 + $0x48] sm:$0xff] }
  0x18   :  { %308 = vmatprep.subr.bf16.mxu1 %v395_v1  ;;  %v315_v16 = vpack.c.bf16 %v125_v15, %v124_v14  ;;  %v318_v19 = vpack.c.bf16 %v127_v18, %v126_v17  ;;  %v128_v20 = vld [vmem:[#allocation3 + $0x50] sm:$0xff]  ;;  %v129_v21 = vld [vmem:[#allocation3 + $0x58] sm:$0xff]  ;;  %v130_v23 = vld [vmem:[#allocation3 + $0x60] sm:$0xff] }
  0x19   :  { %v321_v22 = vpack.c.bf16 %v129_v21, %v128_v20  ;;  %v131_v24 = vld [vmem:[#allocation3 + $0x68] sm:$0xff]  ;;  %v132_v26 = vld [vmem:[#allocation3 + $0x70] sm:$0xff]  ;;  %v133_v27 = vld [vmem:[#allocation3 + $0x78] sm:$0xff] }
  0x1a   :  { %265 = vmatpush3.bf16.msra.mxu0 %v337_v3  ;;  %v324_v25 = vpack.c.bf16 %v131_v24, %v130_v23  ;;  %v327_v28 = vpack.c.bf16 %v133_v27, %v132_v26  ;;  %v240_v29 = vld [vmem:[%s468_s2] ss:$0 sm:$0xff]  ;;  %s396_s2 = smov [#allocation6]  }
  0x1b   :  { %310 = vmatpush3.bf16.msra.mxu1 %v309_v9  ;;  %v241_v36 = vld [vmem:[%s470_s4] ss:$0 sm:$0xff]  ;;  %s228_s14 = sshll.u32 %s396_s2, 4  ;;  %s229_s14 = int_to_ptr.vmem [resolvable:$true] %s228_s14 }
  0x1c   :  { %311 = vmatprep.subr.bf16.mxu1 %v395_v1  ;;  %s364_s4 = scalar_lea.vmem %s229_s14, 64  ;;  %p369_p9 = scmp.lt.s32.totalorder %s229_s14, %s229_s14 }
  0x1d   :  { %267 = vmatmul.mubr.msk.bf16.vlgmr.msra.gmra.mrb[0].mxu0 %vm59_vm1, %v42_v10  ;;  %p365_p8 = scmp.ne.s32.totalorder %s229_s14, %s364_s4  ;;  %p370_p10 = scmp.lt.s32.totalorder %s364_s4, %s364_s4 }
  0x1f   :  { %313 = vmatpush3.bf16.msra.mxu1 %v312_v13  ;;  %p371_p11 = por %p370_p10, %p369_p9 }
  0x20   :  { %314 = vmatprep.subr.bf16.mxu1 %v395_v1 }
  0x21   :  { %p372_p12 = pnand %p371_p11, %p365_p8 }
  0x23   :  { %316 = vmatpush3.bf16.msra.mxu1 %v315_v16 }
  0x24   :  { %317 = vmatprep.subr.bf16.mxu1 %v395_v1 }
  0x27   :  { %319 = vmatpush3.bf16.msra.mxu1 %v318_v19 }
  0x28   :  { %320 = vmatprep.subr.bf16.mxu1 %v395_v1 }
  0x2b   :  { %322 = vmatpush3.bf16.msra.mxu1 %v321_v22 }
  0x2c   :  { %323 = vmatprep.subr.bf16.mxu1 %v395_v1 }
  0x2f   :  { %325 = vmatpush3.bf16.msra.mxu1 %v324_v25 }
  0x30   :  { %326 = vmatprep.subr.bf16.mxu1 %v395_v1 }
  0x33   :  { %328 = vmatpush3.bf16.msra.mxu1 %v327_v28 }
  0xf0   :  { %v97_v30 = vpop.f32.mrb[0].mxu0 }
  0xf1   :  { %v116_v31 = vadd.f32 %v240_v29, %v97_v30  ;;  %v268_v32 = vpop.f32.mrb[1].mxu0 }
  0xf2   :  { %v100_v33 = vpop.f32.mrb[2].mxu0 }
  0xf3   :  { %v117_v34 = vmax.f32 %v116_v31, 0.0  ;;  %v269_v35 = vpop.f32.mrb[3].mxu0 }
  0xf5   :  { %303 = vmatmul.mubr.f32.vlgmr.msra.gmra.mrb[0].mxu1 %v117_v34 }
 0x1c8   :  { %v207_v37 = vpop.f32.mrb[0].mxu1 }
 0x1c9   :  { %v208_v38 = vadd.f32 %v241_v36, %v207_v37  ;;  %v304_v39 = vpop.f32.mrb[1].mxu1 }
 0x1cb   :  { %211 = vmax.xlane.f32.xlu0 %v208_v38 }
 0x258   :  { %v212_v40 = vpop.xlane.xlu0 %211 }
 0x259   :  { %v213_v41 = vsub.f32 %v208_v38, %v212_v40 }
 0x25b   :  { %v214_v42 = vmul.f32 1.442695, %v213_v41 }
 0x25d   :  { %338 = vpow2.f32 %v214_v42 }
 0x267   :  { %v339_v43 = vpop.eup %338 }
 0x268   :  { %216 = vadd.xlane.f32.xlu0 %v339_v43 }
 0x2f5   :  { %v217_v44 = vpop.xlane.xlu0 %216 }
 0x2f6   :  { %340 = vrcp.f32 %v217_v44 }
 0x300   :  { %v341_v45 = vpop.eup %340 }
 0x301   :  { %v219_v46 = vmul.f32 %v341_v45, %v339_v43 }
 0x303   :  { %v220_v47 = vpack.c.bf16 %v219_v46, %v219_v46 }
 0x305   :  { %221 = vst [vmem:[#allocation6] sm:$0xf] %v220_v47 }
 0x306   :  { %375 = shalt.err (!%p372_p12)
}
 0x307   :  { %s376_s17 = scalar_lea.hbm %s471_s5, 64 }
 0x308   :  { %p377_p13 = scmp.ne.s32.totalorder %s471_s5, %s376_s17  ;;  %p380_p0 = scmp.lt.u32.totalorder %s376_s17, %s471_s5 }
 0x30a   :  { %p382_p1 = pnand %p380_p0, %p377_p13 }
 0x30c   :  { %385 = shalt.err (!%p382_p1)
}
 0x30d   :  { %231 = dma.vmem_to_hbm [thread:$0]  %s229_s14, 64, %s471_s5, [#allocation5]  }
 0x30e   :  { %388 = dma.done.wait [#allocation5], 64  }
 0x30f   :  { %389 = vsyncadd [#allocation5], 4294967232 }
 0x310   :  { %235 = vsyncpa [#allocation4], 1 }
 0x311   :  { %236 = vsyncpa [#allocation5], 1 }

</bundles_post_ra>
